<compile_context>
chip_gen: v5e
topology: v5e:2x2
jax: 0.10.0
libtpu: 0.0.40
codegen_flags: <defaults>
</compile_context>

<pallas_src>
import functools

import jax
import jax.numpy as jnp
from jax import lax
from jax.experimental import pallas as pl
from jax.experimental.pallas import tpu as pltpu


def _channel_mix_kernel(x_ref, w_ref, b_ref, o_ref):
    # x_ref: (1, C_in, TILE_V), w_ref: (C_out, C_in), b_ref: (C_out, 1),
    # o_ref: (1, C_out, TILE_V).
    # Ragged last block: out-of-bounds input lanes hold garbage, but the matching
    # output lanes are masked on store and there is no reduction along V -> safe.
    x = x_ref[0].astype(jnp.float32)          # (C_in, TILE_V)
    w = w_ref[...].astype(jnp.float32)        # (C_out, C_in)
    b = b_ref[...].astype(jnp.float32)        # (C_out, 1)
    c_in = x.shape[0]
    if c_in > 8:
        # Larger contraction: single MXU matmul instead of a long VPU FMA chain.
        acc = jnp.dot(w, x, preferred_element_type=jnp.float32) + b
    else:
        # Tiny contraction (typical case, C_in=2): unrolled VPU broadcast-FMAs.
        # The kernel stays HBM-bound; b/w broadcasts happen once per block.
        acc = b + w[:, 0:1] * x[0:1, :]
        for c in range(1, c_in):
            acc = acc + w[:, c:c + 1] * x[c:c + 1, :]
    o_ref[0] = acc.astype(o_ref.dtype)


def _pick_tile_v(v, max_tile):
    """Large lane tile: a multiple of 128, capped at max_tile (V may be ragged)."""
    assert v >= 128
    return min(max_tile, (v // 128) * 128)


def _pointwise_conv_ncv(x3d, w, b, *, max_tile_v=32768, min_pallas_voxels=1 << 18):
    """x3d: (N, C_in, V), w: (C_out, C_in), b: (C_out,) -> (N, C_out, V)."""
    n, c_in, v = x3d.shape
    c_out = w.shape[0]

    # Small-problem / sub-lane-width fallback: a 1-2 step grid is dominated by
    # kernel launch + pipeline warm-up; let XLA handle it.
    if v < 128 or n * v < min_pallas_voxels:
        y = jnp.einsum("oc,ncv->nov", w.astype(jnp.float32),
                       x3d.astype(jnp.float32),
                       precision=jax.lax.Precision.HIGHEST)
        y = y + b.astype(jnp.float32)[None, :, None]
        return y.astype(x3d.dtype)

    tile_v = _pick_tile_v(v, max_tile_v)
    grid = (n, pl.cdiv(v, tile_v))   # ragged last block handled by Pallas masking

    return pl.pallas_call(
        _channel_mix_kernel,
        out_shape=jax.ShapeDtypeStruct((n, c_out, v), x3d.dtype),
        grid_spec=pltpu.PrefetchScalarGridSpec(
            num_scalar_prefetch=0,
            grid=grid,
            in_specs=[
                pl.BlockSpec((1, c_in, tile_v), lambda i, j: (i, 0, j)),
                pl.BlockSpec((c_out, c_in), lambda i, j: (0, 0)),   # resident
                pl.BlockSpec((c_out, 1), lambda i, j: (0, 0)),      # resident
            ],
            out_specs=pl.BlockSpec((1, c_out, tile_v), lambda i, j: (i, 0, j)),
        ),
        compiler_params=pltpu.CompilerParams(
            dimension_semantics=("parallel", "parallel"),
            vmem_limit_bytes=32 * 1024 * 1024),
    )(x3d, w, b.reshape(c_out, 1))


def _upsample2x_axis(y, axis):
    """Exact 2x linear upsample along `axis` (half-pixel centers + edge clamp),
    matching torch.nn.functional.interpolate(scale_factor=2, mode='trilinear',
    align_corners=False) applied separably:
      out[2j]   = 0.75*y[j] + 0.25*y[max(j-1, 0)]
      out[2j+1] = 0.75*y[j] + 0.25*y[min(j+1, L-1)]
    """
    l = y.shape[axis]
    lo = lax.slice_in_dim(y, 0, 1, axis=axis)
    hi = lax.slice_in_dim(y, l - 1, l, axis=axis)
    y_prev = jnp.concatenate([lo, lax.slice_in_dim(y, 0, l - 1, axis=axis)], axis=axis)
    y_next = jnp.concatenate([lax.slice_in_dim(y, 1, l, axis=axis), hi], axis=axis)
    even = 0.75 * y + 0.25 * y_prev
    odd = 0.75 * y + 0.25 * y_next
    out = jnp.stack([even, odd], axis=axis + 1)
    shape = list(y.shape)
    shape[axis] = 2 * l
    return out.reshape(shape)


def self_supervision_brick_forward(x, weight, bias, *, upSampletimes=0,
                                   padImg=True, max_tile_v=32768,
                                   min_pallas_voxels=1 << 18):
    """Forward pass matching SelfSupervisionBrick.

    x:      (N, C_in, D, H, W)            (NCDHW, same as PyTorch; f32 or bf16)
    weight: (C_out, C_in, 1, 1, 1)        (PyTorch Conv3d weight layout)
    bias:   (C_out,)
    """
    n, c_in, d, h, w_dim = x.shape
    c_out = weight.shape[0]

    # Conv3d with kernel_size=1 == per-voxel channel matmul.  Reshape (not
    # transpose!) to (N, C_in, V): a view of the same contiguous buffer.
    w2d = weight.reshape(c_out, c_in)
    x3d = x.reshape(n, c_in, d * h * w_dim)
    y3d = _pointwise_conv_ncv(x3d, w2d, bias, max_tile_v=max_tile_v,
                              min_pallas_voxels=min_pallas_voxels)
    y = y3d.reshape(n, c_out, d, h, w_dim)

    # TODO(synk): fuse the 2x trilinear upsample (and the padImg=False [2:-2]
    # crop) with the channel mix in a Pallas kernel; once upSampletimes > 0 the
    # upsample's extra HBM passes dominate this memory-bound op.
    for _ in range(upSampletimes):
        for ax in (2, 3, 4):
            y = _upsample2x_axis(y, ax)
        if not padImg:
            y = y[:, :, 2:-2, 2:-2, 2:-2]
    return y


if __name__ == "__main__":
    key = jax.random.PRNGKey(0)
    k_w, k_b, k_x, k_x2, k_w2, k_b2, k_x3 = jax.random.split(key, 7)

    # Module hyperparameters (consistent with the PyTorch __init__).
    num_filters = 4
    in_channels = 2
    c_out = num_filters * 3       # 12

    weight = jax.random.normal(k_w, (c_out, in_channels, 1, 1, 1), jnp.float32) * 0.1
    bias = jax.random.normal(k_b, (c_out,), jnp.float32) * 0.01

    def conv_ref(xx, ww, bb):
        co, ci = ww.shape[0], ww.shape[1]
        return (jnp.einsum("ncdhw,oc->nodhw", xx, ww.reshape(co, ci),
                           precision=jax.lax.Precision.HIGHEST)
                + bb.reshape(1, co, 1, 1, 1))

    # --- 1) Main Pallas path (forced), lane-aligned V -------------------------
    x = jax.random.normal(k_x, (2, in_channels, 16, 16, 16), jnp.float32)  # V=4096
    fwd = jax.jit(functools.partial(self_supervision_brick_forward,
                                    upSampletimes=0, padImg=True,
                                    min_pallas_voxels=0))
    out = fwd(x, weight, bias)
    jax.block_until_ready(out)
    ref = conv_ref(x, weight, bias)
    assert out.shape == (2, c_out, 16, 16, 16)
    assert jnp.allclose(out, ref, atol=1e-5), "aligned-V Pallas mismatch"

    # --- 2) Ragged V (not a multiple of 128): masked boundary block ------------
    x_rag = jax.random.normal(k_x2, (1, in_channels, 7, 11, 13), jnp.float32)  # V=1001
    out_rag = fwd(x_rag, weight, bias)
    jax.block_until_ready(out_rag)
    ref_rag = conv_ref(x_rag, weight, bias)
    assert out_rag.shape == (1, c_out, 7, 11, 13)
    assert jnp.allclose(out_rag, ref_rag, atol=1e-5), "ragged-V Pallas mismatch"

    # --- 3) MXU branch (C_in > 8) ----------------------------------------------
    c_in_big = 16
    weight_big = jax.random.normal(k_w2, (c_out, c_in_big, 1, 1, 1), jnp.float32) * 0.1
    bias_big = jax.random.normal(k_b2, (c_out,), jnp.float32) * 0.01
    x_big = jax.random.normal(k_x3, (1, c_in_big, 8, 8, 8), jnp.float32)  # V=512
    out_big = fwd(x_big, weight_big, bias_big)
    jax.block_until_ready(out_big)
    ref_big = conv_ref(x_big, weight_big, bias_big)
    assert jnp.allclose(out_big, ref_big, atol=1e-2, rtol=1e-2), "MXU-branch mismatch"

    # --- 4) Small-problem fallback (default threshold -> einsum path) ----------
    fwd_small = jax.jit(functools.partial(self_supervision_brick_forward,
                                          upSampletimes=0, padImg=True))
    out_small = fwd_small(x, weight, bias)
    jax.block_until_ready(out_small)
    assert jnp.allclose(out_small, ref, atol=1e-5), "fallback mismatch"

    # --- 5) Upsample paths (half-pixel, align_corners=False semantics) ---------
    x_up = x[:, :, :8, :8, :8]
    fwd_up = jax.jit(functools.partial(self_supervision_brick_forward,
                                       upSampletimes=1, padImg=True,
                                       min_pallas_voxels=0))
    out_up = fwd_up(x_up, weight, bias)
    jax.block_until_ready(out_up)
    assert out_up.shape == (2, c_out, 16, 16, 16)
    ref_up = jax.image.resize(conv_ref(x_up, weight, bias),
                              (2, c_out, 16, 16, 16), method="trilinear")
    assert jnp.allclose(out_up, ref_up, atol=1e-4), "upsample mismatch vs resize"

    fwd_crop = jax.jit(functools.partial(self_supervision_brick_forward,
                                         upSampletimes=1, padImg=False,
                                         min_pallas_voxels=0))
    out_crop = fwd_crop(x_up, weight, bias)
    jax.block_until_ready(out_crop)
    assert out_crop.shape == (2, c_out, 12, 12, 12)

    print("KERNEL_OK")
</pallas_src>

<mosaic_0001>
module attributes {stable_mosaic.version = 11 : i64} {
  func.func @_channel_mix_kernel(%arg0: i32, %arg1: i32, %arg2: memref<1x2x4096xf32, #tpu.memory_space<vmem>>, %arg3: memref<12x2xf32, #tpu.memory_space<vmem>>, %arg4: memref<12x1xf32, #tpu.memory_space<vmem>>, %arg5: memref<1x12x4096xf32, #tpu.memory_space<vmem>>) attributes {dimension_semantics = [#tpu.dimension_semantics<parallel>, #tpu.dimension_semantics<parallel>], iteration_bounds = array<i64: 2, 1>, scalar_prefetch = 0 : i64, scratch_operands = 0 : i64, tpu.core_type = #tpu.core_type<tc>, window_params = [{transform_indices = @transform_0, window_bounds = array<i64: 1, 2, 4096>}, {pipeline_mode = #tpu.pipeline_mode<synchronous>, transform_indices = @transform_1, window_bounds = array<i64: 12, 2>}, {pipeline_mode = #tpu.pipeline_mode<synchronous>, transform_indices = @transform_2, window_bounds = array<i64: 12, 1>}, {transform_indices = @transform_3, window_bounds = array<i64: 1, 12, 4096>}]} {
    %c0 = arith.constant 0 : index
    %c0_0 = arith.constant 0 : index
    %c0_1 = arith.constant 0 : index
    %0 = vector.load %arg2[%c0, %c0_0, %c0_1] : memref<1x2x4096xf32, #tpu.memory_space<vmem>>, vector<1x2x4096xf32>
    %1 = vector.shape_cast %0 : vector<1x2x4096xf32> to vector<2x4096xf32>
    %c0_2 = arith.constant 0 : index
    %c0_3 = arith.constant 0 : index
    %2 = vector.load %arg3[%c0_2, %c0_3] : memref<12x2xf32, #tpu.memory_space<vmem>>, vector<12x2xf32>
    %c0_4 = arith.constant 0 : index
    %c0_5 = arith.constant 0 : index
    %3 = vector.load %arg4[%c0_4, %c0_5] : memref<12x1xf32, #tpu.memory_space<vmem>>, vector<12x1xf32>
    %4 = vector.extract_strided_slice %2 {offsets = [0, 0], sizes = [12, 1], strides = [1, 1]} : vector<12x2xf32> to vector<12x1xf32>
    %5 = vector.extract_strided_slice %1 {offsets = [0, 0], sizes = [1, 4096], strides = [1, 1]} : vector<2x4096xf32> to vector<1x4096xf32>
    %6 = vector.broadcast %4 : vector<12x1xf32> to vector<12x4096xf32>
    %7 = vector.broadcast %5 : vector<1x4096xf32> to vector<12x4096xf32>
    %8 = arith.mulf %6, %7 : vector<12x4096xf32>
    %9 = vector.broadcast %3 : vector<12x1xf32> to vector<12x4096xf32>
    %10 = arith.addf %9, %8 : vector<12x4096xf32>
    %11 = vector.extract_strided_slice %2 {offsets = [0, 1], sizes = [12, 1], strides = [1, 1]} : vector<12x2xf32> to vector<12x1xf32>
    %12 = vector.extract_strided_slice %1 {offsets = [1, 0], sizes = [1, 4096], strides = [1, 1]} : vector<2x4096xf32> to vector<1x4096xf32>
    %13 = vector.broadcast %11 : vector<12x1xf32> to vector<12x4096xf32>
    %14 = vector.broadcast %12 : vector<1x4096xf32> to vector<12x4096xf32>
    %15 = arith.mulf %13, %14 : vector<12x4096xf32>
    %16 = arith.addf %10, %15 : vector<12x4096xf32>
    %c0_6 = arith.constant 0 : index
    %c0_7 = arith.constant 0 : index
    %c0_8 = arith.constant 0 : index
    %17 = vector.load %arg5[%c0_6, %c0_7, %c0_8] : memref<1x12x4096xf32, #tpu.memory_space<vmem>>, vector<1x12x4096xf32>
    %18 = vector.shape_cast %17 : vector<1x12x4096xf32> to vector<12x4096xf32>
    %19 = vector.shape_cast %16 : vector<12x4096xf32> to vector<1x12x4096xf32>
    tpu.vector_store %arg5[%c0_6, %c0_7, %c0_8], %19 {strides = array<i32>} : memref<1x12x4096xf32, #tpu.memory_space<vmem>>, vector<1x12x4096xf32>,
    return
  }
  func.func @transform_0(%arg0: i32, %arg1: i32) -> (i32, i32, i32) {
    %c0_i32 = arith.constant 0 : i32
    %c0_i32_0 = arith.constant 0 : i32
    return %arg0, %c0_i32, %arg1 : i32, i32, i32
  }
  func.func @transform_1(%arg0: i32, %arg1: i32) -> (i32, i32) {
    %c0_i32 = arith.constant 0 : i32
    %c0_i32_0 = arith.constant 0 : i32
    %c0_i32_1 = arith.constant 0 : i32
    return %c0_i32, %c0_i32_0 : i32, i32
  }
  func.func @transform_2(%arg0: i32, %arg1: i32) -> (i32, i32) {
    %c0_i32 = arith.constant 0 : i32
    %c0_i32_0 = arith.constant 0 : i32
    %c0_i32_1 = arith.constant 0 : i32
    return %c0_i32, %c0_i32_0 : i32, i32
  }
  func.func @transform_3(%arg0: i32, %arg1: i32) -> (i32, i32, i32) {
    %c0_i32 = arith.constant 0 : i32
    %c0_i32_0 = arith.constant 0 : i32
    return %arg0, %c0_i32, %arg1 : i32, i32, i32
  }
}

</mosaic_0001>

<bundles_post_ra>
// kernel: self_supervision_brick_forward.1
= control target key start
LH: loop header
LB: loop body
LE: loop exit
PB: predicated region body
PF: predicated region fallthrough
CT: control target
= control target key end

     0   :  { %s946_s12 = smov 0   ;;  %s948_s13 = smov 0   ;;  %s1725_s0 = inlined_call_operand.vmem [shape: f32[2,2,4096], index: 0, kind: input, shape index: {}]   ;;  %s1726_s1 = inlined_call_operand.vmem [shape: f32[12,2], index: 1, kind: input, shape index: {}]   ;;  %s1727_s2 = inlined_call_operand.vmem [shape: f32[12,1], index: 2, kind: input, shape index: {}]   ;;  %s1728_s3 = inlined_call_operand.vmem [shape: f32[2,12,4096], index: 3, kind: output, shape index: {}]  }
   0x1   :  { %s950_s14 = smov 0  }
   0x2 LB: > { %s25_s15 = sadd.s32 1, %s918_s13  ;;  %p861_p0 = scmp.ge.s32.totalorder %s922_s14, 1  ;;  %s922_s14 = sphi %s950_s14, %s13_s14   ;;  %s918_s13 = sphi %s948_s13, %s1862_s13   ;;  %s914_s12 = sphi %s946_s12, %s1861_s12  }
   0x3   : > { %p27_p1 = scmp.ge.s32.totalorder %s25_s15, 2  ;;  %p158_p2 = scmp.lt.s32.totalorder %s922_s14, 3 }
   0x5   : > { %s1864_s15 = smov (%p27_p1, %s25_s15), 0  ;;  %p159_p3 = pnand %p861_p0, %p158_p2 }
   0x7   : > { %162 = sbr.rel (%p159_p3) target bundleno = 202 (0xca), region = 32 }
   0xc   : > { %v220_v0 = vld [vmem:[%s1727_s2] sm:$0xff]  ;;  %v924_v2 = vmov 0   ;;  %v925_v3 = vmov 1   ;;  %v221_v4 = vld [vmem:[%s1727_s2 + $0x8] sm:$0xf]  ;;  %p191_p4 = scmp.lt.s32.totalorder %s914_s12, 1 }
   0xd   : > { %v218_v1 = vld [vmem:[%s1726_s1] sm:$0xff]  ;;  %897 = vset.pattern.permute.xlu1 %v924_v2  ;;  %896 = vset.pattern.permute.xlu0 %v924_v2  ;;  %v219_v5 = vld [vmem:[%s1726_s1 + $0x8] sm:$0xf] }
   0xe   : > { %402 = vperm.xlu1 %897, %v220_v0   ;;  %224 = vperm.xlu0 %896, %v218_v1   ;;  %s1866_s12 = smov (!%p191_p4, %s914_s12), 1 }
   0xf   : > { %898 = vset.pattern.permute.xlu2 %v925_v3  ;;  %s868_s24 = sshll.u32 %s1866_s12, 6  ;;  %s869_s28 = sshll.u32 %s1866_s12, 9 }
  0x10   : > { %475 = vperm.xlu2 %898, %v218_v1   ;;  %s982_s27 = scalar_lea.vmem %s1725_s0, %s868_s24  ;;  %s1307_s4 = scalar_lea.vmem %s1728_s3, %s869_s28 }
  0x11   : > { %v985_v6 = vld [vmem:[%s982_s27] sm:$0xff]  ;;  %v988_v7 = vld [vmem:[%s982_s27 + $0x8] sm:$0xff]  ;;  %v999_v16 = vld [vmem:[%s982_s27 + $0x10] sm:$0xff] }
  0x12   : > { %v482_v12 = vperm.slane %v985_v6, 1  ;;  %v483_v17 = vperm.slane %v985_v6, 3  ;;  %v484_v18 = vperm.slane %v985_v6, 5  ;;  %v485_v19 = vperm.slane %v985_v6, 7  ;;  %v1006_v21 = vld [vmem:[%s982_s27 + $0x18] sm:$0xff]  ;;  %v1013_v26 = vld [vmem:[%s982_s27 + $0x20] sm:$0xff] }
  0x13   : > { %v486_v20 = vperm.slane %v988_v7, 1  ;;  %v487_v22 = vperm.slane %v988_v7, 3  ;;  %v488_v23 = vperm.slane %v988_v7, 5  ;;  %v489_v24 = vperm.slane %v988_v7, 7  ;;  %v1020_v31 = vld [vmem:[%s982_s27 + $0x28] sm:$0xff]  ;;  %v1027_v36 = vld [vmem:[%s982_s27 + $0x30] sm:$0xff] }
  0x14   : > { %v490_v25 = vperm.slane %v999_v16, 1  ;;  %v491_v27 = vperm.slane %v999_v16, 3  ;;  %v492_v28 = vperm.slane %v999_v16, 5  ;;  %v493_v29 = vperm.slane %v999_v16, 7  ;;  %v1034_v41 = vld [vmem:[%s982_s27 + $0x38] sm:$0xff] }
  0x15   : > { %v494_v30 = vperm.slane %v1006_v21, 1  ;;  %v495_v32 = vperm.slane %v1006_v21, 3  ;;  %v496_v33 = vperm.slane %v1006_v21, 5  ;;  %v497_v34 = vperm.slane %v1006_v21, 7 }
  0x16   : > { %407 = vperm.xlu1 %897, %v221_v4   ;;  %229 = vperm.xlu0 %896, %v219_v5   ;;  %v498_v35 = vperm.slane %v1013_v26, 1  ;;  %v499_v37 = vperm.slane %v1013_v26, 3  ;;  %v500_v38 = vperm.slane %v1013_v26, 5  ;;  %v501_v39 = vperm.slane %v1013_v26, 7 }
  0x17   : > { %v502_v40 = vperm.slane %v1020_v31, 1  ;;  %v503_v42 = vperm.slane %v1020_v31, 3  ;;  %v504_v43 = vperm.slane %v1020_v31, 5  ;;  %v505_v44 = vperm.slane %v1020_v31, 7 }
  0x18   : > { %479 = vperm.xlu2 %898, %v219_v5   ;;  %v506_v45 = vperm.slane %v1027_v36, 1  ;;  %v507_v46 = vperm.slane %v1027_v36, 3  ;;  %v508_v47 = vperm.slane %v1027_v36, 5  ;;  %v509_v48 = vperm.slane %v1027_v36, 7 }
  0x19   : > { %v510_v49 = vperm.slane %v1034_v41, 1  ;;  %v511_v50 = vperm.slane %v1034_v41, 3  ;;  %v512_v51 = vperm.slane %v1034_v41, 5  ;;  %v513_v52 = vperm.slane %v1034_v41, 7 }
  0x1a   : > { %v1047_v53 = vperm.slane %v482_v12, 1  ;;  %v1049_v54 = vperm.slane %v483_v17, 1  ;;  %v1051_v55 = vperm.slane %v484_v18, 1  ;;  %v1053_v56 = vperm.slane %v485_v19, 1 }
  0x1b   : > { %v1055_v57 = vperm.slane %v486_v20, 1  ;;  %v1057_v58 = vperm.slane %v487_v22, 1  ;;  %v1059_v59 = vperm.slane %v488_v23, 1  ;;  %v1061_v60 = vperm.slane %v489_v24, 1 }
  0x1c   : > { %1766 = vst [vmem:[#allocation2_spill] sm:$0xff] %v1047_v53  ;;  %v1063_v61 = vperm.slane %v490_v25, 1  ;;  %v1065_v62 = vperm.slane %v491_v27, 1  ;;  %v1067_v63 = vperm.slane %v492_v28, 1  ;;  %v1069_v0 = vperm.slane %v493_v29, 1 }
  0x1d   : > { %1767 = vst [vmem:[#allocation3_spill] sm:$0xff] %v1049_v54  ;;  %v1071_v1 = vperm.slane %v494_v30, 1  ;;  %v1073_v2 = vperm.slane %v495_v32, 1  ;;  %v1077_v4 = vperm.slane %v497_v34, 1  ;;  %v1079_v5 = vperm.slane %v498_v35, 1 }
  0x1e   : > { %899 = vset.pattern.permute.xlu0 %v925_v3  ;;  %1768 = vst [vmem:[#allocation4_spill] sm:$0xff] %v1051_v55  ;;  %v1075_v3 = vperm.slane %v496_v33, 1  ;;  %v1081_v12 = vperm.slane %v499_v37, 1  ;;  %v1083_v17 = vperm.slane %v500_v38, 1  ;;  %v1085_v18 = vperm.slane %v501_v39, 1 }
  0x1f   : > { %1769 = vst [vmem:[#allocation5_spill] sm:$0xff] %v1053_v56  ;;  %v1087_v19 = vperm.slane %v502_v40, 1  ;;  %v1089_v20 = vperm.slane %v503_v42, 1  ;;  %v1091_v22 = vperm.slane %v504_v43, 1  ;;  %v1093_v23 = vperm.slane %v505_v44, 1 }
  0x20   : > { %1770 = vst [vmem:[#allocation6_spill] sm:$0xff] %v1055_v57  ;;  %v1095_v24 = vperm.slane %v506_v45, 1  ;;  %v1099_v27 = vperm.slane %v507_v46, 1  ;;  %v1101_v28 = vperm.slane %v508_v47, 1  ;;  %v1103_v29 = vperm.slane %v509_v48, 1 }
  0x21   : > { %1771 = vst [vmem:[#allocation7_spill] sm:$0xff] %v1057_v58  ;;  %v1105_v30 = vperm.slane %v510_v49, 1  ;;  %v1107_v32 = vperm.slane %v511_v50, 1  ;;  %v1109_v33 = vperm.slane %v512_v51, 1  ;;  %v1111_v34 = vperm.slane %v513_v52, 1 }
  0x22   : > { %1772 = vst [vmem:[#allocation8_spill] sm:$0xff] %v1059_v59 }
  0x23   : > { %1773 = vst [vmem:[#allocation9_spill] sm:$0xff] %v1061_v60 }
  0x24   : > { %1774 = vst [vmem:[#allocation10_spill] sm:$0xff] %v1063_v61 }
  0x25   : > { %1775 = vst [vmem:[#allocation11_spill] sm:$0xff] %v1065_v62 }
  0x26   : > { %1776 = vst [vmem:[#allocation12_spill] sm:$0xff] %v1067_v63 }
  0x27   : > { %1777 = vst [vmem:[#allocation13_spill] sm:$0xff] %v1069_v0 }
  0x28   : > { %1778 = vst [vmem:[#allocation14_spill] sm:$0xff] %v1071_v1 }
  0x29   : > { %1779 = vst [vmem:[#allocation15_spill] sm:$0xff] %v1073_v2 }
  0x2a   : > { %1780 = vst [vmem:[#allocation16_spill] sm:$0xff] %v1075_v3 }
  0x2b   : > { %1781 = vst [vmem:[#allocation17_spill] sm:$0xff] %v1077_v4 }
  0x2c   : > { %1782 = vst [vmem:[#allocation18_spill] sm:$0xff] %v1079_v5 }
  0x2d   : > { %1783 = vst [vmem:[#allocation19_spill] sm:$0xff] %v1081_v12 }
  0x2e   : > { %1784 = vst [vmem:[#allocation20_spill] sm:$0xff] %v1083_v17 }
  0x2f   : > { %1785 = vst [vmem:[#allocation21_spill] sm:$0xff] %v1085_v18 }
  0x30   : > { %1786 = vst [vmem:[#allocation22_spill] sm:$0xff] %v1087_v19 }
  0x31   : > { %1787 = vst [vmem:[#allocation23_spill] sm:$0xff] %v1089_v20 }
  0x32   : > { %1788 = vst [vmem:[#allocation24_spill] sm:$0xff] %v1091_v22 }
  0x33   : > { %1789 = vst [vmem:[#allocation25_spill] sm:$0xff] %v1093_v23 }
  0x34   : > { %1790 = vst [vmem:[#allocation26_spill] sm:$0xff] %v1107_v32 }
  0x35   : > { %1791 = vst [vmem:[#allocation27_spill] sm:$0xff] %v1109_v33 }
  0x36   : > { %1792 = vst [vmem:[#allocation28_spill] sm:$0xff] %v1111_v34 }
  0x6a   : > { %v1097_v25 = vpop.permute.xlu2 %475 }
  0x6b   : > { %v1115_v35 = vmul.f32 %v1047_v53, %v1097_v25  ;;  %v1119_v37 = vmul.f32 %v1049_v54, %v1097_v25  ;;  %v1123_v38 = vmul.f32 %v1051_v55, %v1097_v25  ;;  %v1127_v39 = vmul.f32 %v1053_v56, %v1097_v25 }
  0x6c   : > { %v1131_v40 = vmul.f32 %v1055_v57, %v1097_v25  ;;  %v1135_v42 = vmul.f32 %v1057_v58, %v1097_v25  ;;  %v1139_v43 = vmul.f32 %v1059_v59, %v1097_v25  ;;  %v1143_v44 = vmul.f32 %v1061_v60, %v1097_v25 }
  0x6d   : > { %v1147_v45 = vmul.f32 %v1063_v61, %v1097_v25  ;;  %v1151_v46 = vmul.f32 %v1065_v62, %v1097_v25  ;;  %v1155_v47 = vmul.f32 %v1067_v63, %v1097_v25  ;;  %v1159_v48 = vmul.f32 %v1069_v0, %v1097_v25 }
  0x6e   : > { %v1163_v49 = vmul.f32 %v1071_v1, %v1097_v25  ;;  %v1167_v50 = vmul.f32 %v1073_v2, %v1097_v25  ;;  %v1171_v51 = vmul.f32 %v1075_v3, %v1097_v25  ;;  %v1175_v52 = vmul.f32 %v1077_v4, %v1097_v25 }
  0x6f   : > { %v1179_v15 = vmul.f32 %v1079_v5, %v1097_v25  ;;  %v1183_v14 = vmul.f32 %v1081_v12, %v1097_v25  ;;  %v1187_v13 = vmul.f32 %v1083_v17, %v1097_v25  ;;  %v1191_v11 = vmul.f32 %v1085_v18, %v1097_v25 }
  0x70   : > { %v1195_v10 = vmul.f32 %v1087_v19, %v1097_v25  ;;  %v1199_v9 = vmul.f32 %v1089_v20, %v1097_v25  ;;  %v1203_v8 = vmul.f32 %v1091_v22, %v1097_v25  ;;  %v1207_v17 = vmul.f32 %v1093_v23, %v1097_v25 }
  0x71   : > { %v247_v12 = vperm.slane %v988_v7, 6  ;;  %v248_v18 = vperm.slane %v999_v16, 0  ;;  %v249_v5 = vperm.slane %v999_v16, 2  ;;  %v250_v19 = vperm.slane %v999_v16, 4 }
  0x72   : > { %v251_v4 = vperm.slane %v999_v16, 6  ;;  %v252_v20 = vperm.slane %v1006_v21, 0  ;;  %v253_v3 = vperm.slane %v1006_v21, 2  ;;  %v254_v22 = vperm.slane %v1006_v21, 4 }
  0x73   : > { %v255_v2 = vperm.slane %v1006_v21, 6  ;;  %v256_v23 = vperm.slane %v1013_v26, 0  ;;  %v1793_v1 = vperm.slane %v985_v6, 0  ;;  %v1795_v63 = vperm.slane %v985_v6, 2 }
  0x74   : > { %v1797_v16 = vperm.slane %v985_v6, 4  ;;  %v257_v59 = vperm.slane %v1013_v26, 2  ;;  %v1799_v57 = vperm.slane %v985_v6, 6  ;;  %v1803_v6 = vperm.slane %v988_v7, 2 }
  0x75   : > { %v1221_v0 = vperm.slane %v1793_v1, 0  ;;  %v1225_v62 = vperm.slane %v1795_v63, 0  ;;  %v1805_v56 = vperm.slane %v988_v7, 4  ;;  %v1272_v33 = vperm.slane %v248_v18, 0 }
  0x76   : > { %v1229_v61 = vperm.slane %v1797_v16, 0  ;;  %v1238_v1 = vperm.slane %v1799_v57, 0  ;;  %v1801_v16 = vperm.slane %v988_v7, 0  ;;  %v1252_v57 = vperm.slane %v1803_v6, 0 }
  0x77   : > { %1794 = vst [vmem:[#allocation29_spill] sm:$0xff] %v1221_v0  ;;  %v1256_v34 = vperm.slane %v1805_v56, 0  ;;  %v1266_v6 = vperm.slane %v247_v12, 0  ;;  %v1281_v12 = vperm.slane %v250_v19, 0  ;;  %v1292_v58 = vperm.slane %v251_v4, 0 }
  0x78   : > { %1796 = vst [vmem:[#allocation30_spill] sm:$0xff] %v1225_v62  ;;  %v1245_v54 = vperm.slane %v1801_v16, 0  ;;  %v1309_v4 = vperm.slane %v254_v22, 0  ;;  %v1320_v22 = vperm.slane %v255_v2, 0 }
  0x79   : > { %1798 = vst [vmem:[#allocation31_spill] sm:$0xff] %v1229_v61 }
  0x7a   : > { %1800 = vst [vmem:[#allocation32_spill] sm:$0xff] %v1238_v1 }
  0x7b   : > { %1802 = vst [vmem:[#allocation33_spill] sm:$0xff] %v1245_v54 }
  0x7c   : > { %1804 = vst [vmem:[#allocation34_spill] sm:$0xff] %v1252_v57 }
  0x7d   : > { %1806 = vst [vmem:[#allocation35_spill] sm:$0xff] %v1266_v6 }
  0x7e   : > { %1807 = vst [vmem:[#allocation36_spill] sm:$0xff] %v1272_v33 }
  0x7f   : > { %1809 = vst [vmem:[#allocation38_spill] sm:$0xff] %v1281_v12 }
  0x80   : > { %v1231_v60 = vpop.permute.xlu0 %224  ;;  %v1276_v32 = vpop.permute.xlu1 %402 }
  0x81   : > { %v336_v55 = vmul.f32 %v1221_v0, %v1231_v60  ;;  %v337_v16 = vmul.f32 %v1225_v62, %v1231_v60  ;;  %v338_v21 = vmul.f32 %v1229_v61, %v1231_v60  ;;  %v339_v7 = vmul.f32 %v1238_v1, %v1231_v60 }
  0x82   : > { %v340_v62 = vmul.f32 %v1245_v54, %v1231_v60  ;;  %v1279_v61 = vperm.slane %v249_v5, 0  ;;  %v341_v53 = vmul.f32 %v1252_v57, %v1231_v60  ;;  %v342_v63 = vmul.f32 %v1256_v34, %v1231_v60 }
  0x83   : > { %v410_v18 = vadd.f32 %v1276_v32, %v336_v55  ;;  %v411_v56 = vadd.f32 %v1276_v32, %v337_v16  ;;  %v412_v54 = vadd.f32 %v1276_v32, %v338_v21  ;;  %v343_v5 = vmul.f32 %v1266_v6, %v1231_v60 }
  0x84   : > { %1808 = vst [vmem:[#allocation37_spill] sm:$0xff] %v1279_v61  ;;  %v413_v19 = vadd.f32 %v1276_v32, %v339_v7  ;;  %v1297_v57 = vperm.slane %v252_v20, 0  ;;  %v1299_v0 = vperm.slane %v253_v3, 0  ;;  %v344_v55 = vmul.f32 %v1272_v33, %v1231_v60 }
  0x85   : > { %v414_v16 = vadd.f32 %v1276_v32, %v340_v62  ;;  %v345_v21 = vmul.f32 %v1279_v61, %v1231_v60  ;;  %v346_v3 = vmul.f32 %v1281_v12, %v1231_v60  ;;  %v415_v20 = vadd.f32 %v1276_v32, %v341_v53 }
  0x86   : > { %v416_v7 = vadd.f32 %v1276_v32, %v342_v63  ;;  %v642_v62 = vadd.f32 %v1115_v35, %v410_v18  ;;  %v643_v1 = vadd.f32 %v1119_v37, %v411_v56  ;;  %v644_v33 = vadd.f32 %v1123_v38, %v412_v54 }
  0x87   : > { %v347_v6 = vmul.f32 %v1292_v58, %v1231_v60  ;;  %v417_v61 = vadd.f32 %v1276_v32, %v343_v5  ;;  %v645_v12 = vadd.f32 %v1127_v39, %v413_v19  ;;  %v1326_v53 = vperm.slane %v256_v23, 0 }
  0x88   : > { %v348_v35 = vmul.f32 %v1297_v57, %v1231_v60  ;;  %v418_v63 = vadd.f32 %v1276_v32, %v344_v55  ;;  %v646_v37 = vadd.f32 %v1131_v40, %v414_v16  ;;  %706 = vst [vmem:[%s1307_s4] sm:$0xff] %v642_v62  ;;  %v1333_v54 = vperm.slane %v257_v59, 0 }
  0x89   : > { %v349_v2 = vmul.f32 %v1299_v0, %v1231_v60  ;;  %v419_v38 = vadd.f32 %v1276_v32, %v345_v21  ;;  %v647_v39 = vadd.f32 %v1135_v42, %v415_v20  ;;  %707 = vst [vmem:[%s1307_s4 + $0x8] sm:$0xff] %v643_v1  ;;  %v1810_v23 = vperm.slane %v1013_v26, 4 }
  0x8a   : > { %v350_v40 = vmul.f32 %v1309_v4, %v1231_v60  ;;  %v420_v18 = vadd.f32 %v1276_v32, %v346_v3  ;;  %v648_v59 = vadd.f32 %v1139_v43, %v416_v7  ;;  %708 = vst [vmem:[%s1307_s4 + $0x10] sm:$0xff] %v644_v33  ;;  %v1811_v5 = vperm.slane %v1013_v26, 6 }
  0x8b   : > { %v1342_v56 = vperm.slane %v1810_v23, 0  ;;  %v351_v42 = vmul.f32 %v1320_v22, %v1231_v60  ;;  %v421_v1 = vadd.f32 %v1276_v32, %v347_v6  ;;  %v649_v55 = vadd.f32 %v1143_v44, %v417_v61  ;;  %709 = vst [vmem:[%s1307_s4 + $0x18] sm:$0xff] %v645_v12 }
  0x8c   : > { %v1351_v19 = vperm.slane %v1811_v5, 0  ;;  %v1812_v16 = vperm.slane %v1020_v31, 0  ;;  %v352_v33 = vmul.f32 %v1326_v53, %v1231_v60  ;;  %v422_v26 = vadd.f32 %v1276_v32, %v348_v35  ;;  %710 = vst [vmem:[%s1307_s4 + $0x20] sm:$0xff] %v646_v37 }
  0x8d   : > { %v650_v43 = vadd.f32 %v1147_v45, %v418_v63  ;;  %v1813_v3 = vperm.slane %v1020_v31, 2  ;;  %v353_v61 = vmul.f32 %v1333_v54, %v1231_v60  ;;  %v423_v44 = vadd.f32 %v1276_v32, %v349_v2  ;;  %711 = vst [vmem:[%s1307_s4 + $0x28] sm:$0xff] %v647_v39 }
  0x8e   : > { %v1360_v21 = vperm.slane %v1812_v16, 0  ;;  %v651_v12 = vadd.f32 %v1151_v46, %v419_v38  ;;  %v1814_v20 = vperm.slane %v1020_v31, 4  ;;  %v354_v45 = vmul.f32 %v1342_v56, %v1231_v60  ;;  %712 = vst [vmem:[%s1307_s4 + $0x30] sm:$0xff] %v648_v59 }
  0x8f   : > { %v1369_v6 = vperm.slane %v1813_v3, 0  ;;  %v424_v62 = vadd.f32 %v1276_v32, %v350_v40  ;;  %v652_v35 = vadd.f32 %v1155_v47, %v420_v18  ;;  %v1815_v63 = vperm.slane %v1020_v31, 6  ;;  %713 = vst [vmem:[%s1307_s4 + $0x38] sm:$0xff] %v649_v55 }
  0x90   : > { %v1378_v7 = vperm.slane %v1814_v20, 0  ;;  %v355_v46 = vmul.f32 %v1351_v19, %v1231_v60  ;;  %v425_v2 = vadd.f32 %v1276_v32, %v351_v42  ;;  %v653_v38 = vadd.f32 %v1159_v48, %v421_v1  ;;  %714 = vst [vmem:[%s1307_s4 + $0x40] sm:$0xff] %v650_v43 }
  0x91   : > { %v1387_v37 = vperm.slane %v1815_v63, 0  ;;  %v1816_v39 = vperm.slane %v1027_v36, 0  ;;  %v356_v47 = vmul.f32 %v1360_v21, %v1231_v60  ;;  %v426_v31 = vadd.f32 %v1276_v32, %v352_v33  ;;  %715 = vst [vmem:[%s1307_s4 + $0x48] sm:$0xff] %v651_v12 }
  0x92   : > { %v654_v40 = vadd.f32 %v1163_v49, %v422_v26  ;;  %v1817_v18 = vperm.slane %v1027_v36, 2  ;;  %v357_v48 = vmul.f32 %v1369_v6, %v1231_v60  ;;  %v427_v5 = vadd.f32 %v1276_v32, %v353_v61  ;;  %716 = vst [vmem:[%s1307_s4 + $0x50] sm:$0xff] %v652_v35 }
  0x93   : > { %v1396_v23 = vperm.slane %v1816_v39, 0  ;;  %v655_v42 = vadd.f32 %v1167_v50, %v423_v44  ;;  %v1818_v1 = vperm.slane %v1027_v36, 4  ;;  %v358_v49 = vmul.f32 %v1378_v7, %v1231_v60  ;;  %717 = vst [vmem:[%s1307_s4 + $0x58] sm:$0xff] %v653_v38 }
  0x94   : > { %v1405_v59 = vperm.slane %v1817_v18, 0  ;;  %v428_v16 = vadd.f32 %v1276_v32, %v354_v45  ;;  %v656_v33 = vadd.f32 %v1171_v51, %v424_v62  ;;  %v1819_v26 = vperm.slane %v1027_v36, 6  ;;  %718 = vst [vmem:[%s1307_s4 + $0x60] sm:$0xff] %v654_v40 }
  0x95   : > { %v1414_v55 = vperm.slane %v1818_v1, 0  ;;  %v359_v50 = vmul.f32 %v1387_v37, %v1231_v60  ;;  %v429_v3 = vadd.f32 %v1276_v32, %v355_v46  ;;  %v657_v61 = vadd.f32 %v1175_v52, %v425_v2  ;;  %719 = vst [vmem:[%s1307_s4 + $0x68] sm:$0xff] %v655_v42  ;;  %v1475_v1 = vpop.permute.xlu0 %229 }
  0x96   : > { %v1423_v43 = vperm.slane %v1819_v26, 0  ;;  %v1820_v44 = vperm.slane %v1034_v41, 0  ;;  %v360_v51 = vmul.f32 %v1396_v23, %v1231_v60  ;;  %v430_v36 = vadd.f32 %v1276_v32, %v356_v47  ;;  %720 = vst [vmem:[%s1307_s4 + $0x70] sm:$0xff] %v656_v33 }
  0x97   : > { %v658_v20 = vadd.f32 %v1179_v15, %v426_v31  ;;  %v1821_v45 = vperm.slane %v1034_v41, 2  ;;  %v361_v52 = vmul.f32 %v1405_v59, %v1231_v60  ;;  %v431_v35 = vadd.f32 %v1276_v32, %v357_v48  ;;  %721 = vst [vmem:[%s1307_s4 + $0x78] sm:$0xff] %v657_v61 }
  0x98   : > { %v1432_v12 = vperm.slane %v1820_v44, 0  ;;  %v659_v63 = vadd.f32 %v1183_v14, %v427_v5  ;;  %v1822_v46 = vperm.slane %v1034_v41, 4  ;;  %v362_v15 = vmul.f32 %v1414_v55, %v1231_v60 }
  0x99   : > { %v1441_v62 = vperm.slane %v1821_v45, 0  ;;  %v432_v38 = vadd.f32 %v1276_v32, %v358_v49  ;;  %v660_v39 = vadd.f32 %v1187_v13, %v428_v16  ;;  %v1823_v47 = vperm.slane %v1034_v41, 6  ;;  %722 = vst [vmem:[%s1307_s4 + $0x80] sm:$0xff] %v658_v20 }
  0x9a   : > { %v1450_v2 = vperm.slane %v1822_v46, 0  ;;  %v363_v14 = vmul.f32 %v1423_v43, %v1231_v60  ;;  %v433_v40 = vadd.f32 %v1276_v32, %v359_v50  ;;  %v661_v18 = vadd.f32 %v1191_v11, %v429_v3  ;;  %723 = vst [vmem:[%s1307_s4 + $0x88] sm:$0xff] %v659_v63 }
  0x9b   : > { %v1459_v31 = vperm.slane %v1823_v47, 0  ;;  %v602_v48 = vmul.f32 %v1095_v24, %v1097_v25  ;;  %v364_v13 = vmul.f32 %v1432_v12, %v1231_v60  ;;  %v434_v41 = vadd.f32 %v1276_v32, %v360_v51  ;;  %724 = vst [vmem:[%s1307_s4 + $0x90] sm:$0xff] %v660_v39  ;;  %v1828_v39 = vld [vmem:[#allocation31_spill] sm:$0xff] }
  0x9c   : > { %v662_v5 = vadd.f32 %v1195_v10, %v430_v36  ;;  %v603_v42 = vmul.f32 %v1099_v27, %v1097_v25  ;;  %v365_v11 = vmul.f32 %v1441_v62, %v1231_v60  ;;  %v435_v49 = vadd.f32 %v1276_v32, %v361_v52  ;;  %725 = vst [vmem:[%s1307_s4 + $0x98] sm:$0xff] %v661_v18  ;;  %v1824_v36 = vld [vmem:[#allocation29_spill] sm:$0xff]  ;;  %v1825_v52 = vld [vmem:[#allocation26_spill] sm:$0xff]  ;;  %v1514_v18 = vpop.permute.xlu2 %479 }
  0x9d   : > { %v663_v16 = vadd.f32 %v1199_v9, %v431_v35  ;;  %v604_v33 = vmul.f32 %v1101_v28, %v1097_v25  ;;  %v366_v10 = vmul.f32 %v1450_v2, %v1231_v60  ;;  %v436_v26 = vadd.f32 %v1276_v32, %v362_v15  ;;  %v1827_v15 = vld [vmem:[#allocation27_spill] sm:$0xff] }
  0x9e   : > { %v664_v50 = vadd.f32 %v1203_v8, %v432_v38  ;;  %v605_v3 = vmul.f32 %v1103_v29, %v1097_v25  ;;  %v367_v9 = vmul.f32 %v1459_v31, %v1231_v60  ;;  %v437_v61 = vadd.f32 %v1276_v32, %v363_v14  ;;  %726 = vst [vmem:[%s1307_s4 + $0xa0] sm:$0xff] %v662_v5  ;;  %v1826_v60 = vld [vmem:[#allocation30_spill] sm:$0xff]  ;;  %v1830_v5 = vld [vmem:[#allocation32_spill] sm:$0xff] }
  0x9f   : > { %v665_v44 = vadd.f32 %v1207_v17, %v433_v40  ;;  %v606_v51 = vmul.f32 %v1105_v30, %v1097_v25  ;;  %v368_v8 = vmul.f32 %v1824_v36, %v1475_v1  ;;  %v438_v20 = vadd.f32 %v1276_v32, %v364_v13  ;;  %727 = vst [vmem:[%s1307_s4 + $0xa8] sm:$0xff] %v663_v16  ;;  %v1831_v16 = vld [vmem:[#allocation33_spill] sm:$0xff] }
  0xa0   : > { %v666_v45 = vadd.f32 %v602_v48, %v434_v41  ;;  %v607_v35 = vmul.f32 %v1825_v52, %v1097_v25  ;;  %v369_v63 = vmul.f32 %v1826_v60, %v1475_v1  ;;  %v439_v17 = vadd.f32 %v1276_v32, %v365_v11  ;;  %728 = vst [vmem:[%s1307_s4 + $0xb0] sm:$0xff] %v664_v50  ;;  %v1829_v48 = vld [vmem:[#allocation28_spill] sm:$0xff]  ;;  %v1518_v41 = vpop.permute.xlu1 %407 }
  0xa1   : > { %v667_v46 = vadd.f32 %v603_v42, %v435_v49  ;;  %v608_v38 = vmul.f32 %v1827_v15, %v1097_v25  ;;  %v370_v47 = vmul.f32 %v1828_v39, %v1475_v1  ;;  %v440_v14 = vadd.f32 %v1276_v32, %v366_v10  ;;  %729 = vst [vmem:[%s1307_s4 + $0xb8] sm:$0xff] %v665_v44 }
  0xa2   : > { %v668_v40 = vadd.f32 %v604_v33, %v436_v26  ;;  %v609_v13 = vmul.f32 %v1829_v48, %v1097_v25  ;;  %v371_v42 = vmul.f32 %v1830_v5, %v1475_v1  ;;  %v441_v11 = vadd.f32 %v1276_v32, %v367_v9  ;;  %730 = vst [vmem:[%s1307_s4 + $0xc0] sm:$0xff] %v666_v45  ;;  %v1832_v25 = vld [vmem:[#allocation34_spill] sm:$0xff]  ;;  %v1839_v5 = vld [vmem:[#allocation37_spill] sm:$0xff] }
  0xa3   : > { %v669_v49 = vadd.f32 %v605_v3, %v437_v61  ;;  %v372_v33 = vmul.f32 %v1831_v16, %v1475_v1  ;;  %v442_v10 = vadd.f32 %v1518_v41, %v368_v8  ;;  %v670_v26 = vadd.f32 %v606_v51, %v438_v20  ;;  %731 = vst [vmem:[%s1307_s4 + $0xc8] sm:$0xff] %v667_v46  ;;  %v1833_v32 = vld [vmem:[#allocation2_spill] sm:$0xff]  ;;  %v1834_v51 = vld [vmem:[#allocation3_spill] sm:$0xff] }
  0xa4   : > { %v373_v50 = vmul.f32 %v1832_v25, %v1475_v1  ;;  %v443_v36 = vadd.f32 %v1518_v41, %v369_v63  ;;  %v671_v60 = vadd.f32 %v607_v35, %v439_v17  ;;  %v610_v3 = vmul.f32 %v1833_v32, %v1514_v18  ;;  %732 = vst [vmem:[%s1307_s4 + $0xd0] sm:$0xff] %v668_v40  ;;  %v1835_v20 = vld [vmem:[#allocation35_spill] sm:$0xff]  ;;  %v1836_v17 = vld [vmem:[#allocation4_spill] sm:$0xff]  ;;  %v1841_v25 = vld [vmem:[#allocation38_spill] sm:$0xff] }
  0xa5   : > { %v374_v9 = vmul.f32 %v1256_v34, %v1475_v1  ;;  %v444_v61 = vadd.f32 %v1518_v41, %v370_v47  ;;  %v672_v44 = vadd.f32 %v608_v38, %v440_v14  ;;  %v611_v8 = vmul.f32 %v1834_v51, %v1514_v18  ;;  %733 = vst [vmem:[%s1307_s4 + $0xd8] sm:$0xff] %v669_v49  ;;  %v1837_v34 = vld [vmem:[#allocation36_spill] sm:$0xff]  ;;  %v1838_v14 = vld [vmem:[#allocation5_spill] sm:$0xff]  ;;  %v1840_v49 = vld [vmem:[#allocation6_spill] sm:$0xff] }
  0xa6   : > { %v375_v45 = vmul.f32 %v1835_v20, %v1475_v1  ;;  %v445_v35 = vadd.f32 %v1518_v41, %v371_v42  ;;  %v673_v63 = vadd.f32 %v609_v13, %v441_v11  ;;  %v612_v46 = vmul.f32 %v1836_v17, %v1514_v18  ;;  %734 = vst [vmem:[%s1307_s4 + $0xe0] sm:$0xff] %v670_v26  ;;  %v1842_v32 = vld [vmem:[#allocation7_spill] sm:$0xff]  ;;  %v1843_v51 = vld [vmem:[#allocation8_spill] sm:$0xff]  ;;  %v1844_v20 = vld [vmem:[#allocation9_spill] sm:$0xff] }
  0xa7   : > { %v376_v39 = vmul.f32 %v1837_v34, %v1475_v1  ;;  %v446_v38 = vadd.f32 %v1518_v41, %v372_v33  ;;  %v674_v47 = vadd.f32 %v610_v3, %v442_v10  ;;  %v613_v40 = vmul.f32 %v1838_v14, %v1514_v18  ;;  %735 = vst [vmem:[%s1307_s4 + $0xe8] sm:$0xff] %v671_v60 }
  0xa8   : > { %v377_v42 = vmul.f32 %v1839_v5, %v1475_v1  ;;  %v447_v13 = vadd.f32 %v1518_v41, %v373_v50  ;;  %v675_v11 = vadd.f32 %v611_v8, %v443_v36  ;;  %v614_v16 = vmul.f32 %v1840_v49, %v1514_v18  ;;  %736 = vst [vmem:[%s1307_s4 + $0xf0] sm:$0xff] %v672_v44  ;;  %v1847_v5 = vld [vmem:[#allocation12_spill] sm:$0xff]  ;;  %v1848_v49 = vld [vmem:[#allocation13_spill] sm:$0xff] }
  0xa9   : > { %v378_v33 = vmul.f32 %v1841_v25, %v1475_v1  ;;  %v448_v10 = vadd.f32 %v1518_v41, %v374_v9  ;;  %v676_v26 = vadd.f32 %v612_v46, %v444_v61  ;;  %v615_v3 = vmul.f32 %v1842_v32, %v1514_v18  ;;  %737 = vst [vmem:[%s1307_s4 + $0xf8] sm:$0xff] %v673_v63  ;;  %v1845_v63 = vld [vmem:[#allocation10_spill] sm:$0xff] }
  0xaa   : > { %v379_v50 = vmul.f32 %v1292_v58, %v1475_v1  ;;  %v449_v36 = vadd.f32 %v1518_v41, %v375_v45  ;;  %v677_v60 = vadd.f32 %v613_v40, %v445_v35  ;;  %v616_v8 = vmul.f32 %v1843_v51, %v1514_v18  ;;  %738 = vst [vmem:[%s1307_s4 + $0x100] sm:$0xf] %v674_v47 }
  0xab   : > { %v380_v9 = vmul.f32 %v1297_v57, %v1475_v1  ;;  %v450_v61 = vadd.f32 %v1518_v41, %v376_v39  ;;  %v678_v44 = vadd.f32 %v614_v16, %v446_v38  ;;  %v617_v17 = vmul.f32 %v1844_v20, %v1514_v18  ;;  %739 = vst [vmem:[%s1307_s4 + $0x108] sm:$0xf] %v675_v11  ;;  %v1846_v38 = vld [vmem:[#allocation11_spill] sm:$0xff]  ;;  %v1852_v20 = vld [vmem:[#allocation17_spill] sm:$0xff] }
  0xac   : > { %v381_v58 = vmul.f32 %v1299_v0, %v1475_v1  ;;  %v451_v45 = vadd.f32 %v1518_v41, %v377_v42  ;;  %v679_v35 = vadd.f32 %v615_v3, %v447_v13  ;;  %v618_v46 = vmul.f32 %v1845_v63, %v1514_v18  ;;  %740 = vst [vmem:[%s1307_s4 + $0x110] sm:$0xf] %v676_v26 }
  0xad   : > { %v382_v57 = vmul.f32 %v1309_v4, %v1475_v1  ;;  %v452_v34 = vadd.f32 %v1518_v41, %v378_v33  ;;  %v680_v39 = vadd.f32 %v616_v8, %v448_v10  ;;  %v619_v47 = vmul.f32 %v1846_v38, %v1514_v18  ;;  %741 = vst [vmem:[%s1307_s4 + $0x118] sm:$0xf] %v677_v60  ;;  %v1849_v10 = vld [vmem:[#allocation14_spill] sm:$0xff]  ;;  %v1851_v8 = vld [vmem:[#allocation16_spill] sm:$0xff] }
  0xae   : > { %v383_v0 = vmul.f32 %v1320_v22, %v1475_v1  ;;  %v453_v14 = vadd.f32 %v1518_v41, %v379_v50  ;;  %v681_v40 = vadd.f32 %v617_v17, %v449_v36  ;;  %v620_v42 = vmul.f32 %v1847_v5, %v1514_v18  ;;  %742 = vst [vmem:[%s1307_s4 + $0x120] sm:$0xf] %v678_v44  ;;  %v1850_v50 = vld [vmem:[#allocation15_spill] sm:$0xff] }
  0xaf   : > { %v384_v4 = vmul.f32 %v1326_v53, %v1475_v1  ;;  %v454_v13 = vadd.f32 %v1518_v41, %v380_v9  ;;  %v682_v11 = vadd.f32 %v618_v46, %v450_v61  ;;  %v621_v16 = vmul.f32 %v1848_v49, %v1514_v18  ;;  %743 = vst [vmem:[%s1307_s4 + $0x128] sm:$0xf] %v679_v35  ;;  %v1853_v35 = vld [vmem:[#allocation18_spill] sm:$0xff] }
  0xb0   : > { %v385_v22 = vmul.f32 %v1333_v54, %v1475_v1  ;;  %v455_v25 = vadd.f32 %v1518_v41, %v381_v58  ;;  %v683_v33 = vadd.f32 %v619_v47, %v451_v45  ;;  %v622_v26 = vmul.f32 %v1849_v10, %v1514_v18  ;;  %744 = vst [vmem:[%s1307_s4 + $0x130] sm:$0xf] %v680_v39  ;;  %v1857_v49 = vld [vmem:[#allocation22_spill] sm:$0xff] }
  0xb1   : > { %v386_v53 = vmul.f32 %v1342_v56, %v1475_v1  ;;  %v456_v32 = vadd.f32 %v1518_v41, %v382_v57  ;;  %v684_v3 = vadd.f32 %v620_v42, %v452_v34  ;;  %v623_v36 = vmul.f32 %v1850_v50, %v1514_v18  ;;  %745 = vst [vmem:[%s1307_s4 + $0x138] sm:$0xf] %v681_v40  ;;  %v1854_v34 = vld [vmem:[#allocation19_spill] sm:$0xff]  ;;  %v1856_v42 = vld [vmem:[#allocation21_spill] sm:$0xff] }
  0xb2   : > { %v387_v54 = vmul.f32 %v1351_v19, %v1475_v1  ;;  %v457_v60 = vadd.f32 %v1518_v41, %v383_v0  ;;  %v685_v51 = vadd.f32 %v621_v16, %v453_v14  ;;  %v624_v9 = vmul.f32 %v1851_v8, %v1514_v18  ;;  %746 = vst [vmem:[%s1307_s4 + $0x140] sm:$0xf] %v682_v11  ;;  %v1855_v0 = vld [vmem:[#allocation20_spill] sm:$0xff] }
  0xb3   : > { %v388_v56 = vmul.f32 %v1360_v21, %v1475_v1  ;;  %v458_v61 = vadd.f32 %v1518_v41, %v384_v4  ;;  %v686_v44 = vadd.f32 %v622_v26, %v454_v13  ;;  %v625_v17 = vmul.f32 %v1852_v20, %v1514_v18  ;;  %747 = vst [vmem:[%s1307_s4 + $0x148] sm:$0xf] %v683_v33  ;;  %v1858_v33 = vld [vmem:[#allocation23_spill] sm:$0xff] }
  0xb4   : > { %v389_v19 = vmul.f32 %v1369_v6, %v1475_v1  ;;  %v459_v58 = vadd.f32 %v1518_v41, %v385_v22  ;;  %v687_v45 = vadd.f32 %v623_v36, %v455_v25  ;;  %v626_v63 = vmul.f32 %v1853_v35, %v1514_v18  ;;  %748 = vst [vmem:[%s1307_s4 + $0x150] sm:$0xf] %v684_v3 }
  0xb5   : > { %v390_v21 = vmul.f32 %v1378_v7, %v1475_v1  ;;  %v460_v46 = vadd.f32 %v1518_v41, %v386_v53  ;;  %v688_v57 = vadd.f32 %v624_v9, %v456_v32  ;;  %v627_v39 = vmul.f32 %v1854_v34, %v1514_v18  ;;  %749 = vst [vmem:[%s1307_s4 + $0x158] sm:$0xf] %v685_v51  ;;  %v1859_v32 = vld [vmem:[#allocation24_spill] sm:$0xff] }
  0xb6   : > { %v391_v6 = vmul.f32 %v1387_v37, %v1475_v1  ;;  %v461_v38 = vadd.f32 %v1518_v41, %v387_v54  ;;  %v689_v47 = vadd.f32 %v625_v17, %v457_v60  ;;  %v628_v14 = vmul.f32 %v1855_v0, %v1514_v18  ;;  %750 = vst [vmem:[%s1307_s4 + $0x160] sm:$0xf] %v686_v44  ;;  %v1860_v54 = vld [vmem:[#allocation25_spill] sm:$0xff] }
  0xb7   : > { %v392_v7 = vmul.f32 %v1396_v23, %v1475_v1  ;;  %v462_v40 = vadd.f32 %v1518_v41, %v388_v56  ;;  %v690_v5 = vadd.f32 %v626_v63, %v458_v61  ;;  %v629_v4 = vmul.f32 %v1856_v42, %v1514_v18  ;;  %751 = vst [vmem:[%s1307_s4 + $0x168] sm:$0xf] %v687_v45 }
  0xb8   : > { %v393_v37 = vmul.f32 %v1405_v59, %v1475_v1  ;;  %v463_v13 = vadd.f32 %v1518_v41, %v389_v19  ;;  %v691_v11 = vadd.f32 %v627_v39, %v459_v58  ;;  %v630_v16 = vmul.f32 %v1857_v49, %v1514_v18  ;;  %752 = vst [vmem:[%s1307_s4 + $0x170] sm:$0xf] %v688_v57 }
  0xb9   : > { %v394_v23 = vmul.f32 %v1414_v55, %v1475_v1  ;;  %v464_v22 = vadd.f32 %v1518_v41, %v390_v21  ;;  %v692_v25 = vadd.f32 %v628_v14, %v460_v46  ;;  %v631_v10 = vmul.f32 %v1858_v33, %v1514_v18  ;;  %753 = vst [vmem:[%s1307_s4 + $0x178] sm:$0xf] %v689_v47 }
  0xba   : > { %v395_v59 = vmul.f32 %v1423_v43, %v1475_v1  ;;  %v465_v26 = vadd.f32 %v1518_v41, %v391_v6  ;;  %v693_v53 = vadd.f32 %v629_v4, %v461_v38  ;;  %v632_v3 = vmul.f32 %v1859_v32, %v1514_v18  ;;  %754 = vst [vmem:[%s1307_s4 + $0x180] sm:$0xf] %v690_v5 }
  0xbb   : > { %v396_v55 = vmul.f32 %v1432_v12, %v1475_v1  ;;  %v466_v50 = vadd.f32 %v1518_v41, %v392_v7  ;;  %v694_v36 = vadd.f32 %v630_v16, %v462_v40  ;;  %v633_v60 = vmul.f32 %v1860_v54, %v1514_v18  ;;  %755 = vst [vmem:[%s1307_s4 + $0x188] sm:$0xf] %v691_v11 }
  0xbc   : > { %v397_v43 = vmul.f32 %v1441_v62, %v1475_v1  ;;  %v467_v51 = vadd.f32 %v1518_v41, %v393_v37  ;;  %v695_v8 = vadd.f32 %v631_v10, %v463_v13  ;;  %v634_v9 = vmul.f32 %v1095_v24, %v1514_v18  ;;  %756 = vst [vmem:[%s1307_s4 + $0x190] sm:$0xf] %v692_v25 }
  0xbd   : > { %v398_v12 = vmul.f32 %v1450_v2, %v1475_v1  ;;  %v468_v56 = vadd.f32 %v1518_v41, %v394_v23  ;;  %v696_v61 = vadd.f32 %v632_v3, %v464_v22  ;;  %v635_v44 = vmul.f32 %v1099_v27, %v1514_v18  ;;  %757 = vst [vmem:[%s1307_s4 + $0x198] sm:$0xf] %v693_v53 }
  0xbe   : > { %v399_v62 = vmul.f32 %v1459_v31, %v1475_v1  ;;  %v469_v20 = vadd.f32 %v1518_v41, %v395_v59  ;;  %v697_v17 = vadd.f32 %v633_v60, %v465_v26  ;;  %v636_v24 = vmul.f32 %v1101_v28, %v1514_v18  ;;  %758 = vst [vmem:[%s1307_s4 + $0x1a0] sm:$0xf] %v694_v36 }
  0xbf   : > { %v470_v2 = vadd.f32 %v1518_v41, %v396_v55  ;;  %v698_v19 = vadd.f32 %v634_v9, %v466_v50  ;;  %v637_v27 = vmul.f32 %v1103_v29, %v1514_v18  ;;  %v471_v58 = vadd.f32 %v1518_v41, %v397_v43  ;;  %759 = vst [vmem:[%s1307_s4 + $0x1a8] sm:$0xf] %v695_v8 }
  0xc0   : > { %v699_v31 = vadd.f32 %v635_v44, %v467_v51  ;;  %v638_v1 = vmul.f32 %v1105_v30, %v1514_v18  ;;  %v472_v45 = vadd.f32 %v1518_v41, %v398_v12  ;;  %v700_v28 = vadd.f32 %v636_v24, %v468_v56  ;;  %760 = vst [vmem:[%s1307_s4 + $0x1b0] sm:$0xf] %v696_v61 }
  0xc1   : > { %v639_v35 = vmul.f32 %v1825_v52, %v1514_v18  ;;  %v473_v29 = vadd.f32 %v1518_v41, %v399_v62  ;;  %v701_v63 = vadd.f32 %v637_v27, %v469_v20  ;;  %761 = vst [vmem:[%s1307_s4 + $0x1b8] sm:$0xf] %v697_v17  ;;  %v640_v21 = vmul.f32 %v1827_v15, %v1514_v18 }
  0xc2   : > { %v702_v30 = vadd.f32 %v638_v1, %v470_v2  ;;  %762 = vst [vmem:[%s1307_s4 + $0x1c0] sm:$0xf] %v698_v19  ;;  %v641_v46 = vmul.f32 %v1829_v48, %v1514_v18 }
  0xc3   : > { %v703_v57 = vadd.f32 %v639_v35, %v471_v58  ;;  %763 = vst [vmem:[%s1307_s4 + $0x1c8] sm:$0xf] %v699_v31  ;;  %v704_v34 = vadd.f32 %v640_v21, %v472_v45 }
  0xc4   : > { %764 = vst [vmem:[%s1307_s4 + $0x1d0] sm:$0xf] %v700_v28  ;;  %v705_v39 = vadd.f32 %v641_v46, %v473_v29 }
  0xc5   : > { %765 = vst [vmem:[%s1307_s4 + $0x1d8] sm:$0xf] %v701_v63 }
  0xc6   : > { %766 = vst [vmem:[%s1307_s4 + $0x1e0] sm:$0xf] %v702_v30 }
  0xc7   : > { %767 = vst [vmem:[%s1307_s4 + $0x1e8] sm:$0xf] %v703_v57 }
  0xc8   : > { %768 = vst [vmem:[%s1307_s4 + $0x1f0] sm:$0xf] %v704_v34 }
  0xc9   : > { %769 = vst [vmem:[%s1307_s4 + $0x1f8] sm:$0xf] %v705_v39 }
  0xca PF: > { %s13_s14 = sadd.s32 1, %s922_s14   ;;  %s1861_s12 = smov %s918_s13 }
  0xcb   : > { %p10_p5 = scmp.ge.s32.totalorder %s13_s14, 4   ;;  %s1862_s13 = smov %s1864_s15 }
  0xcd   :  { %12 = sbr.rel (!%p10_p5) target bundleno = 2 (0x2), region = 62 }

</bundles_post_ra>
